<compile_context>
chip_gen: v5e
topology: v5e:2x2
jax: 0.10.0
libtpu: 0.0.40
codegen_flags: <defaults>
</compile_context>

<pallas_src>
import functools

import jax
import jax.numpy as jnp
from jax.experimental import pallas as pl
from jax.experimental.pallas import tpu as pltpu


# ---------------------------------------------------------------------------
# Chip-dependent budgets (v5e/v6e: 128 MiB physical VMEM, v7x: 64 MiB)
# ---------------------------------------------------------------------------
def _device_kind():
    try:
        return jax.devices()[0].device_kind.lower()
    except Exception:
        return ""


def _vmem_capacity_bytes():
    try:
        cap = int(pltpu.get_tpu_info().vmem_capacity_bytes)
        if cap > 0:
            return cap
    except Exception:
        pass
    kind = _device_kind()
    if any(v in kind for v in ("v4", "v5", "v6")):
        return 128 * 1024 * 1024
    return 64 * 1024 * 1024                  # v7x-safe default


_VMEM_CAPACITY = _vmem_capacity_bytes()
# Scoped VMEM limit: ~96 MiB on 128-MiB chips (v5e/v6e), ~48 MiB on v7x.
_VMEM_LIMIT = int(min(_VMEM_CAPACITY * 3 // 4, 112 * 1024 * 1024))
# Per-block x budget: leaves room for 3x input + 3x output buffers + temps.
# -> ~12 MiB blocks on v5e/v6e, ~6 MiB on v7x.
_DEFAULT_BLOCK_BYTES = _VMEM_LIMIT // 8
# bf16-native rescale only where the VPU has bf16 ALUs (v6e / v7x).
_HAS_BF16_VALU = any(v in _device_kind() for v in ("v6", "v7"))

_MIN_SINGLE_PASS_GRID = 4                    # >=4 blocks so both v7x TCs stream


def _round_up(a, m):
    return ((a + m - 1) // m) * m


def _sublane_pack(dtype):
    """Packed sublane tile height: 8 for f32, 16 for bf16, 32 for int8/fp8."""
    return max(8, 32 // jnp.dtype(dtype).itemsize)


def _maybe_buffered(block_shape, index_map, grid_steps, nbuf=3):
    """Triple-buffered streaming BlockSpec (falls back to default buffering)."""
    if grid_steps >= nbuf:
        try:
            return pl.BlockSpec(block_shape, index_map,
                                pipeline_mode=pl.Buffered(nbuf))
        except Exception:
            pass
    return pl.BlockSpec(block_shape, index_map)


# ---------------------------------------------------------------------------
# Kernels
# ---------------------------------------------------------------------------
def _wn_single_pass_kernel(x_ref, rm_ref, out_ref, new_rm_ref, *,
                           momentum, eps, inv_n, native_rescale):
    """x_ref: (B, C_TILE, N); rm_ref/new_rm_ref: (C_TILE, 1) f32."""
    rm = rm_ref[...]
    if momentum > 0.0:
        # Cast feeds straight into the reduction (no full-block f32 temp kept
        # live across the rescale below). Batch-axis reduce first (pure VPU
        # adds), then a single lane reduce (XLU).
        xf = x_ref[...].astype(jnp.float32)
        ssq = jnp.sum(xf * xf, axis=0)                        # (C_TILE, N)
        y = jnp.sum(ssq, axis=-1, keepdims=True) * inv_n      # (C_TILE, 1)
        new_rm = (1.0 - momentum) * rm + momentum * y
    else:
        new_rm = rm
    factor = jax.lax.rsqrt(new_rm + eps)                      # EUP
    new_rm_ref[...] = new_rm
    # Re-read / re-cast x for the output write instead of reusing `xf` so the
    # f32 block temp is not live across the whole reduction.
    if native_rescale:
        out_ref[...] = x_ref[...] * factor.astype(out_ref.dtype)[None, :, :]
    else:
        out_ref[...] = (x_ref[...].astype(jnp.float32)
                        * factor[None, :, :]).astype(out_ref.dtype)


def _wn_moment_kernel(x_ref, rm_ref, new_rm_ref, factor_ref, acc_ref, *,
                      momentum, eps, inv_n, n_total, n_tile):
    """Two-pass / pass 1: accumulate per-channel sum(x^2) over the N grid axis."""
    n_idx = pl.program_id(1)
    last_n = pl.num_programs(1) - 1

    @pl.when(n_idx == 0)
    def _():
        acc_ref[...] = jnp.zeros_like(acc_ref)

    has_remainder = (n_total % n_tile) != 0   # static python bool
    if has_remainder:
        # Boundary mask only on the last N tile (keeps every other block
        # free of the iota/compare/select VALU overhead).
        @pl.when(n_idx < last_n)
        def _():
            xf = x_ref[...].astype(jnp.float32)
            ssq = jnp.sum(xf * xf, axis=0)                     # VPU batch reduce
            acc_ref[...] += jnp.sum(ssq, axis=-1, keepdims=True)   # XLU lane reduce

        @pl.when(n_idx == last_n)
        def _():
            xf = x_ref[...].astype(jnp.float32)
            lane = (jax.lax.broadcasted_iota(jnp.int32, xf.shape, 2)
                    + n_idx * n_tile)
            xf = jnp.where(lane < n_total, xf, 0.0)
            ssq = jnp.sum(xf * xf, axis=0)
            acc_ref[...] += jnp.sum(ssq, axis=-1, keepdims=True)
    else:
        xf = x_ref[...].astype(jnp.float32)
        ssq = jnp.sum(xf * xf, axis=0)
        acc_ref[...] += jnp.sum(ssq, axis=-1, keepdims=True)

    @pl.when(n_idx == last_n)
    def _():
        rm = rm_ref[...]
        y = acc_ref[...] * inv_n
        new_rm = (1.0 - momentum) * rm + momentum * y
        new_rm_ref[...] = new_rm
        factor_ref[...] = jax.lax.rsqrt(new_rm + eps)


def _wn_scale_kernel(x_ref, factor_ref, out_ref, *, native_rescale):
    """Two-pass / pass 2: out = x * factor (per channel)."""
    if native_rescale:
        out_ref[...] = x_ref[...] * factor_ref[...].astype(out_ref.dtype)[None, :, :]
    else:
        out_ref[...] = (x_ref[...].astype(jnp.float32)
                        * factor_ref[...][None, :, :]).astype(out_ref.dtype)


# ---------------------------------------------------------------------------
# Tiling helpers
# ---------------------------------------------------------------------------
def _single_pass_c_tile(C, bytes_per_channel, budget, pack):
    """Packed channel tile fitting the budget, capped so the grid has >=4 steps."""
    if C <= pack:
        return C if C * bytes_per_channel <= budget else None
    want = int(budget // bytes_per_channel)
    want = (want // pack) * pack
    if want < pack:
        return None
    c_tile = min(want, (C // pack) * pack)
    # Keep >= _MIN_SINGLE_PASS_GRID "parallel" blocks so both v7x TensorCores
    # stream and per-TC DMA/compute pipelining has work to overlap.
    cap = max(pack, ((C // _MIN_SINGLE_PASS_GRID) // pack) * pack)
    return min(c_tile, cap)


def _two_pass_tiles(B, C, N, itemsize, pack, budget):
    """Packed channel tile (up to 128) + lane-dense N tile for the 2-pass path."""
    if C <= pack:
        c_tile = C
    else:
        # Target n_tile >= 512 lanes; pick the largest packed channel tile
        # (capped at 128) that keeps B*c_tile*512*itemsize within the budget.
        by_budget = (budget // max(1, B * itemsize * 512) // pack) * pack
        c_tile = min(128, (C // pack) * pack)
        if by_budget >= pack:
            c_tile = min(c_tile, by_budget)
        else:
            c_tile = pack
    n_tile = int(budget // max(1, B * c_tile * itemsize))
    n_tile = max((n_tile // 128) * 128, 128)
    n_tile = min(n_tile, _round_up(N, 128))
    return c_tile, n_tile


# ---------------------------------------------------------------------------
# pallas_call wrappers
# ---------------------------------------------------------------------------
def _single_pass(x3, rm2, c_tile, momentum, eps, native_rescale):
    B, C, N = (int(s) for s in x3.shape)
    itemsize = jnp.dtype(x3.dtype).itemsize
    grid_steps = pl.cdiv(C, c_tile)
    kernel = functools.partial(_wn_single_pass_kernel, momentum=momentum,
                               eps=float(eps), inv_n=1.0 / float(B * N),
                               native_rescale=native_rescale)
    x_spec = _maybe_buffered((B, c_tile, N), lambda c: (0, c, 0), grid_steps)
    o_spec = _maybe_buffered((B, c_tile, N), lambda c: (0, c, 0), grid_steps)
    return pl.pallas_call(
        kernel,
        out_shape=(jax.ShapeDtypeStruct((B, C, N), x3.dtype),
                   jax.ShapeDtypeStruct((C, 1), jnp.float32)),
        grid=(grid_steps,),
        in_specs=[x_spec,
                  pl.BlockSpec((c_tile, 1), lambda c: (c, 0))],
        out_specs=(o_spec,
                   pl.BlockSpec((c_tile, 1), lambda c: (c, 0))),
        input_output_aliases={1: 1},      # running_moment -> new running_moment
        compiler_params=pltpu.CompilerParams(
            dimension_semantics=("parallel",),
            vmem_limit_bytes=_VMEM_LIMIT),
        cost_estimate=pl.CostEstimate(
            flops=3 * B * C * N + 4 * C,
            transcendentals=C,
            bytes_accessed=2 * B * C * N * itemsize + 3 * C * 4),
    )(x3, rm2)


def _two_pass(x3, rm2, momentum, eps, budget, pack, native_rescale):
    B, C, N = (int(s) for s in x3.shape)
    itemsize = jnp.dtype(x3.dtype).itemsize
    c_tile, n_tile = _two_pass_tiles(B, C, N, itemsize, pack, budget)
    grid = (pl.cdiv(C, c_tile), pl.cdiv(N, n_tile))
    grid_steps = grid[0] * grid[1]

    if momentum > 0.0:
        kernel1 = functools.partial(
            _wn_moment_kernel, momentum=momentum, eps=float(eps),
            inv_n=1.0 / float(B * N), n_total=N, n_tile=n_tile)
        new_rm, factor = pl.pallas_call(
            kernel1,
            out_shape=(jax.ShapeDtypeStruct((C, 1), jnp.float32),
                       jax.ShapeDtypeStruct((C, 1), jnp.float32)),
            grid=grid,
            in_specs=[pl.BlockSpec((B, c_tile, n_tile), lambda c, n: (0, c, n)),
                      pl.BlockSpec((c_tile, 1), lambda c, n: (c, 0))],
            out_specs=(pl.BlockSpec((c_tile, 1), lambda c, n: (c, 0)),
                       pl.BlockSpec((c_tile, 1), lambda c, n: (c, 0))),
            scratch_shapes=[pltpu.VMEM((c_tile, 1), jnp.float32)],
            input_output_aliases={1: 0},
            compiler_params=pltpu.CompilerParams(
                dimension_semantics=("parallel", "arbitrary"),
                vmem_limit_bytes=_VMEM_LIMIT),
            cost_estimate=pl.CostEstimate(
                flops=2 * B * C * N + 4 * C,
                transcendentals=C,
                bytes_accessed=B * C * N * itemsize + 3 * C * 4),
        )(x3, rm2)
    else:
        new_rm = rm2
        factor = jax.lax.rsqrt(rm2 + float(eps))   # tiny [C,1]; plain XLA

    kernel2 = functools.partial(_wn_scale_kernel, native_rescale=native_rescale)
    x_spec = _maybe_buffered((B, c_tile, n_tile), lambda c, n: (0, c, n), grid_steps)
    o_spec = _maybe_buffered((B, c_tile, n_tile), lambda c, n: (0, c, n), grid_steps)
    out3 = pl.pallas_call(
        kernel2,
        out_shape=jax.ShapeDtypeStruct((B, C, N), x3.dtype),
        grid=grid,
        in_specs=[x_spec,
                  pl.BlockSpec((c_tile, 1), lambda c, n: (c, 0))],
        out_specs=o_spec,
        compiler_params=pltpu.CompilerParams(
            dimension_semantics=("parallel", "parallel"),
            vmem_limit_bytes=_VMEM_LIMIT),
        cost_estimate=pl.CostEstimate(
            flops=B * C * N,
            transcendentals=0,
            bytes_accessed=2 * B * C * N * itemsize + C * 4),
    )(x3, factor)
    return out3, new_rm


def weightnorm_forward(x, running_moment, *, momentum=0.1, eps=1e-5,
                       training=True, max_block_bytes=None):
    """x: [B, C, ...] (any spatial rank / dtype). Returns (out, new_running_moment)."""
    orig_shape = x.shape
    B, C = int(x.shape[0]), int(x.shape[1])
    N = 1
    for s in x.shape[2:]:
        N *= int(s)
    x3 = x.reshape(B, C, N)                        # free reshape, no transpose
    rm2 = running_moment.reshape(C, 1).astype(jnp.float32)

    m = float(momentum) if training else 0.0       # eval mode == momentum 0
    itemsize = jnp.dtype(x.dtype).itemsize
    pack = _sublane_pack(x.dtype)
    budget = _DEFAULT_BLOCK_BYTES if max_block_bytes is None else int(max_block_bytes)
    # bf16-native rescale only on chips with bf16 VALUs (v6e/v7x); f32 elsewhere.
    native_rescale = bool(x.dtype == jnp.bfloat16) and _HAS_BF16_VALU

    bytes_per_channel = B * N * itemsize
    c_tile = _single_pass_c_tile(C, bytes_per_channel, budget, pack)
    if c_tile is not None:
        out3, new_rm = _single_pass(x3, rm2, c_tile, m, eps, native_rescale)
    else:
        out3, new_rm = _two_pass(x3, rm2, m, eps, budget, pack, native_rescale)
    return out3.reshape(orig_shape), new_rm.reshape(C)


# ---------------------------------------------------------------------------
# Reference + test
# ---------------------------------------------------------------------------
def _reference(x, running_moment, momentum=0.1, eps=1e-5, training=True):
    xf = x.astype(jnp.float32)
    rm = running_moment.astype(jnp.float32)
    if training and momentum > 0:
        y = (xf ** 2).reshape(x.shape[0], x.shape[1], -1).mean(-1).mean(0)
        rm = (1 - momentum) * rm + momentum * y
    factor = 1.0 / jnp.sqrt(rm + eps)
    shape = (1, -1) + (1,) * (x.ndim - 2)
    out = (xf * factor.reshape(shape)).astype(x.dtype)
    return out, rm


if __name__ == "__main__":
    key = jax.random.PRNGKey(0)
    k1, k2, k3 = jax.random.split(key, 3)

    fwd = jax.jit(weightnorm_forward,
                  static_argnames=("momentum", "eps", "training",
                                   "max_block_bytes"))

    # Test 1: f32 NCHW, single-pass path (training), tiny shape / 1-block grid.
    B, C, H, W = 2, 4, 16, 16
    x = jax.random.normal(k1, (B, C, H, W), dtype=jnp.float32)
    rm0 = jnp.ones((C,), dtype=jnp.float32)
    out, new_rm = fwd(x, rm0, momentum=0.1, eps=1e-5, training=True)
    jax.block_until_ready((out, new_rm))
    ref_out, ref_rm = _reference(x, rm0, 0.1, 1e-5, True)
    assert jnp.allclose(out, ref_out, atol=1e-5, rtol=1e-5)
    assert jnp.allclose(new_rm, ref_rm, atol=1e-5, rtol=1e-5)

    # Test 2: bf16 input, forced two-pass path (tiny block budget); channel and
    # spatial extents that do not divide the tiles exercise the packed channel
    # tile and the pl.when-gated boundary-mask epilogue.
    B2, C2, H2, W2 = 2, 12, 16, 20
    xb = jax.random.normal(k2, (B2, C2, H2, W2),
                           dtype=jnp.float32).astype(jnp.bfloat16)
    rmb = jnp.linspace(0.5, 1.5, C2, dtype=jnp.float32)
    outb, new_rmb = fwd(xb, rmb, momentum=0.1, eps=1e-5, training=True,
                        max_block_bytes=4096)
    jax.block_until_ready((outb, new_rmb))
    refb_out, refb_rm = _reference(xb, rmb, 0.1, 1e-5, True)
    assert outb.dtype == jnp.bfloat16
    assert jnp.allclose(outb.astype(jnp.float32), refb_out.astype(jnp.float32),
                        atol=2e-2, rtol=2e-2)
    assert jnp.allclose(new_rmb, refb_rm, atol=1e-4, rtol=1e-4)

    # Test 3: eval mode (no moment update).
    oute, rme = fwd(x, rm0, momentum=0.1, eps=1e-5, training=False)
    jax.block_until_ready((oute, rme))
    refe_out, refe_rm = _reference(x, rm0, 0.1, 1e-5, False)
    assert jnp.allclose(oute, refe_out, atol=1e-5, rtol=1e-5)
    assert jnp.allclose(rme, refe_rm, atol=1e-6, rtol=1e-6)

    # Test 4: larger C -> multi-block "parallel" single-pass grid (>=4 steps),
    # triple-buffered streaming specs, and a padded boundary channel block.
    B4, C4, H4, W4 = 2, 72, 32, 32
    x4 = jax.random.normal(k3, (B4, C4, H4, W4), dtype=jnp.float32)
    rm4 = jnp.linspace(0.8, 1.2, C4, dtype=jnp.float32)
    out4, new_rm4 = fwd(x4, rm4, momentum=0.1, eps=1e-5, training=True)
    jax.block_until_ready((out4, new_rm4))
    ref4_out, ref4_rm = _reference(x4, rm4, 0.1, 1e-5, True)
    assert jnp.allclose(out4, ref4_out, atol=2e-5, rtol=2e-5)
    assert jnp.allclose(new_rm4, ref4_rm, atol=2e-5, rtol=2e-5)

    print("KERNEL_OK")
</pallas_src>

<mosaic_0001>
module attributes {stable_mosaic.version = 11 : i64} {
  func.func @_wn_single_pass_kernel(%arg0: i32, %arg1: memref<2x4x256xf32, #tpu.memory_space<vmem>>, %arg2: memref<4x1xf32, #tpu.memory_space<vmem>>, %arg3: memref<2x4x256xf32, #tpu.memory_space<vmem>>, %arg4: memref<4x1xf32, #tpu.memory_space<vmem>>) attributes {dimension_semantics = [#tpu.dimension_semantics<parallel>], iteration_bounds = array<i64: 1>, scalar_prefetch = 0 : i64, scratch_operands = 0 : i64, tpu.core_type = #tpu.core_type<tc>, window_params = [{transform_indices = @transform_0, window_bounds = array<i64: 2, 4, 256>}, {transform_indices = @transform_1, window_bounds = array<i64: 4, 1>}, {transform_indices = @transform_2, window_bounds = array<i64: 2, 4, 256>}, {transform_indices = @transform_3, window_bounds = array<i64: 4, 1>}]} {
    %c0 = arith.constant 0 : index
    %c0_0 = arith.constant 0 : index
    %0 = vector.load %arg2[%c0, %c0_0] : memref<4x1xf32, #tpu.memory_space<vmem>>, vector<4x1xf32>
    %c0_1 = arith.constant 0 : index
    %c0_2 = arith.constant 0 : index
    %c0_3 = arith.constant 0 : index
    %1 = vector.load %arg1[%c0_1, %c0_2, %c0_3] : memref<2x4x256xf32, #tpu.memory_space<vmem>>, vector<2x4x256xf32>
    %2 = arith.mulf %1, %1 : vector<2x4x256xf32>
    %cst = arith.constant dense<0.000000e+00> : vector<4x256xf32>
    %3 = vector.multi_reduction <add>, %2, %cst [0] : vector<2x4x256xf32> to vector<4x256xf32>
    %cst_4 = arith.constant dense<0.000000e+00> : vector<4xf32>
    %4 = vector.multi_reduction <add>, %3, %cst_4 [1] : vector<4x256xf32> to vector<4xf32>
    %5 = vector.shape_cast %4 : vector<4xf32> to vector<4x1xf32>
    %cst_5 = arith.constant 0.001953125 : f32
    %6 = vector.broadcast %cst_5 : f32 to vector<4x1xf32>
    %7 = arith.mulf %5, %6 : vector<4x1xf32>
    %cst_6 = arith.constant 0.899999976 : f32
    %8 = vector.broadcast %cst_6 : f32 to vector<4x1xf32>
    %9 = arith.mulf %8, %0 : vector<4x1xf32>
    %cst_7 = arith.constant 1.000000e-01 : f32
    %10 = vector.broadcast %cst_7 : f32 to vector<4x1xf32>
    %11 = arith.mulf %10, %7 : vector<4x1xf32>
    %12 = arith.addf %9, %11 : vector<4x1xf32>
    %cst_8 = arith.constant 9.99999974E-6 : f32
    %13 = vector.broadcast %cst_8 : f32 to vector<4x1xf32>
    %14 = arith.addf %12, %13 : vector<4x1xf32>
    %15 = math.rsqrt %14 : vector<4x1xf32>
    %c0_9 = arith.constant 0 : index
    %c0_10 = arith.constant 0 : index
    %16 = vector.load %arg4[%c0_9, %c0_10] : memref<4x1xf32, #tpu.memory_space<vmem>>, vector<4x1xf32>
    tpu.vector_store %arg4[%c0_9, %c0_10], %12 {strides = array<i32>} : memref<4x1xf32, #tpu.memory_space<vmem>>, vector<4x1xf32>,
    %c0_11 = arith.constant 0 : index
    %c0_12 = arith.constant 0 : index
    %c0_13 = arith.constant 0 : index
    %17 = vector.load %arg1[%c0_11, %c0_12, %c0_13] : memref<2x4x256xf32, #tpu.memory_space<vmem>>, vector<2x4x256xf32>
    %18 = vector.shape_cast %15 : vector<4x1xf32> to vector<1x4x1xf32>
    %19 = vector.broadcast %18 : vector<1x4x1xf32> to vector<2x4x256xf32>
    %20 = arith.mulf %17, %19 : vector<2x4x256xf32>
    %c0_14 = arith.constant 0 : index
    %c0_15 = arith.constant 0 : index
    %c0_16 = arith.constant 0 : index
    %21 = vector.load %arg3[%c0_14, %c0_15, %c0_16] : memref<2x4x256xf32, #tpu.memory_space<vmem>>, vector<2x4x256xf32>
    tpu.vector_store %arg3[%c0_14, %c0_15, %c0_16], %20 {strides = array<i32>} : memref<2x4x256xf32, #tpu.memory_space<vmem>>, vector<2x4x256xf32>,
    return
  }
  func.func @transform_0(%arg0: i32) -> (i32, i32, i32) {
    %c0_i32 = arith.constant 0 : i32
    %c0_i32_0 = arith.constant 0 : i32
    %c0_i32_1 = arith.constant 0 : i32
    return %c0_i32, %arg0, %c0_i32_0 : i32, i32, i32
  }
  func.func @transform_1(%arg0: i32) -> (i32, i32) {
    %c0_i32 = arith.constant 0 : i32
    %c0_i32_0 = arith.constant 0 : i32
    return %arg0, %c0_i32 : i32, i32
  }
  func.func @transform_2(%arg0: i32) -> (i32, i32, i32) {
    %c0_i32 = arith.constant 0 : i32
    %c0_i32_0 = arith.constant 0 : i32
    %c0_i32_1 = arith.constant 0 : i32
    return %c0_i32, %arg0, %c0_i32_0 : i32, i32, i32
  }
  func.func @transform_3(%arg0: i32) -> (i32, i32) {
    %c0_i32 = arith.constant 0 : i32
    %c0_i32_0 = arith.constant 0 : i32
    return %arg0, %c0_i32 : i32, i32
  }
}

</mosaic_0001>

<bundles_post_ra>
// kernel: weightnorm_forward.1
= control target key start
LH: loop header
LB: loop body
LE: loop exit
PB: predicated region body
PF: predicated region fallthrough
CT: control target
= control target key end

     0   :  { %vm31_vm0 = vcmask 1043456   ;;  %v88_v17 = vmov 0   ;;  %vm58_vm1 = vcmask 3072   ;;  %v89_v32 = vmov 839922192   ;;  %s128_s0 = inlined_call_operand.vmem [shape: f32[2,4,256], index: 0, kind: input, shape index: {}]   ;;  %s129_s1 = inlined_call_operand.vmem [shape: f32[4,1], index: 1, kind: input, shape index: {}, may-alias: {1,3}]   ;;  %s130_s3 = inlined_call_operand.vmem [shape: f32[4,1], index: 3, kind: output, shape index: {1}, may-alias: {1,3}]   ;;  %s131_s2 = inlined_call_operand.vmem [shape: f32[2,4,256], index: 2, kind: output, shape index: {0}]  }
   0x1   :  { %v14_v0 = vld [vmem:[%s128_s0] sm:$0xff]  ;;  %v15_v1 = vld [vmem:[%s128_s0 + $0x8] sm:$0xff]  ;;  %85 = vset.pattern.permute.xlu0 %v88_v17  ;;  %v67_v33 = vunpack.c.l.s4 %v89_v32 }
   0x2   :  { %v16_v2 = vmul.f32 %v14_v0, %v14_v0  ;;  %v17_v3 = vmul.f32 %v15_v1, %v15_v1  ;;  %v13_v18 = vld [vmem:[%s129_s1] sm:$0xf] }
   0x3   :  { %v44_v20 = vmul.f32 0.9, %v13_v18  ;;  %v68_v34 = vunpack.c.0.s8 %v67_v33 }
   0x4   :  { %20 = vst [vmem:[#allocation1] ss:$2 sm:$0xff] %v16_v2 }
   0x5   :  { %24 = vst [vmem:[#allocation1 + $0x10] ss:$2 sm:$0xff] %v17_v3 }
   0xb   :  { %v21_v4 = vld.sshfl [vmem:[#allocation1] sm:$0xff pattern:$0x75316420]  ;;  %v22_v5 = vld.sshfl [vmem:[#allocation1 + $0x8] sm:$0xff pattern:$0x75316420] }
   0xc   :  { %v25_v6 = vld.sshfl [vmem:[#allocation1 + $0x10] sm:$0xff pattern:$0x75316420]  ;;  %v26_v7 = vld.sshfl [vmem:[#allocation1 + $0x18] sm:$0xff pattern:$0x75316420] }
   0xd   :  { %v32_v8 = vsel %vm31_vm0, %v21_v4, 0.0  ;;  %v33_v9 = vsel %vm31_vm0, %v25_v6, 0.0  ;;  %v35_v10 = vsel %vm31_vm0, %v22_v5, 0.0  ;;  %v36_v11 = vsel %vm31_vm0, %v26_v7, 0.0 }
   0xe   :  { %v34_v12 = vadd.f32 %v33_v9, %v32_v8  ;;  %v37_v13 = vadd.f32 %v36_v11, %v35_v10 }
  0x10   :  { %v38_v14 = vsel %vm31_vm0, %v34_v12, 0.0  ;;  %v39_v15 = vsel %vm31_vm0, %v37_v13, 0.0 }
  0x11   :  { %v40_v16 = vadd.f32 %v39_v15, %v38_v14 }
  0x13   :  { %41 = vadd.xlane.f32.xlu0 %v40_v16 }
  0x86   :  { %v42_v19 = vpop.xlane.xlu0 %41 }
  0x87   :  { %v43_v21 = vmul.f32 0.001953125, %v42_v19 }
  0x89   :  { %v45_v22 = vmul.f32 0.1, %v43_v21 }
  0x8b   :  { %v46_v23 = vadd.f32 %v45_v22, %v44_v20 }
  0x8d   :  { %v47_v24 = vadd.f32 1e-05, %v46_v23  ;;  %59 = vst.msk [vmem:[%s130_s3] sm:$0xf] %vm58_vm1, %v46_v23 }
  0x8f   :  { %86 = vrsqrt.f32 %v47_v24  ;;  %vm54_vm3 = vweird.f32 %v47_v24 }
  0x95   :  { %v87_v25 = vpop.eup %86 }
  0x96   :  { %v49_v26 = vmul.f32 %v87_v25, %v47_v24  ;;  %vm55_vm2 = vweird.f32 %v87_v25 }
  0x97   :  { %vm56_vm4 = vmor %vm54_vm3, %vm55_vm2 }
  0x98   :  { %v50_v27 = vmul.f32 %v87_v25, %v49_v26 }
  0x9a   :  { %v51_v28 = vmul.f32 0.5, %v50_v27 }
  0x9c   :  { %v52_v29 = vsub.f32 1.5, %v51_v28 }
  0x9e   :  { %v53_v30 = vmul.f32 %v87_v25, %v52_v29 }
  0xa0   :  { %v57_v31 = vsel %vm56_vm4, %v87_v25, %v53_v30 }
  0xa1   :  { %64 = vperm.xlu0 %85, %v57_v31  }
 0x113   :  { %v65_v35 = vpop.permute.xlu0 %64 }
 0x114   :  { %v69_v36 = vperm.slane %v65_v35, %v68_v34 }
 0x116   :  { %v71_v37 = vmul.f32 %v69_v36, %v14_v0  ;;  %v72_v38 = vmul.f32 %v69_v36, %v15_v1 }
 0x118   :  { %73 = vst [vmem:[%s131_s2] sm:$0xff] %v71_v37 }
 0x119   :  { %74 = vst [vmem:[%s131_s2 + $0x8] sm:$0xff] %v72_v38 }

</bundles_post_ra>
